<compile_context>
chip_gen: v6e
topology: v6e:2x2x1
jax: 0.10.0
libtpu: 0.0.40
codegen_flags: <defaults>
</compile_context>

<pallas_src>
import math

import jax
import jax.numpy as jnp
from jax.experimental import pallas as pl
from jax.experimental.pallas import tpu as pltpu

_LANE = 128
_SUBLANE_BY_ITEMSIZE = {4: 8, 2: 16, 1: 32}   # rows per sublane group, by dtype width
_MIN_GRID_STEPS = 8                            # enough steps to shard/pipeline on v7x
_MIN_TF = 4 * _LANE                            # keep per-row DMA runs >= 2 KiB (f32)
_BYPASS_BYTES = 1 << 20                        # below this, let XLA fuse the multiply


def _round_up(x: int, m: int) -> int:
    return ((x + m - 1) // m) * m


def _target_block_bytes() -> int:
    # Bigger blocks on v7x: at 3.2 TB/s a 2 MiB block streams in ~1.3 us, so the
    # ~0.35 us per-grid-step overhead would be ~25% of step time.  4 MiB already
    # sits on the measured 85-86% HBM-roofline plateau on v5e/v6e.
    try:
        kind = jax.devices()[0].device_kind.lower()
    except Exception:  # pragma: no cover - defensive fallback
        kind = ""
    if "v7" in kind or "7x" in kind:
        return 8 * 1024 * 1024
    return 4 * 1024 * 1024


def _drop_path_kernel(scale_ref, x_ref, o_ref):
    # scale_ref: (TB, 1) f32 per-sample scale (0.0 or 1/keep_prob).
    # x_ref / o_ref: (TB, TF) activation tile.  Single broadcast vmul per vreg
    # (promoted to f32), cast back to the output dtype.  Memory-roofline bound.
    o_ref[...] = (x_ref[...] * scale_ref[...]).astype(o_ref.dtype)


def _choose_tiles(batch: int, feat_pad: int, itemsize: int, target_bytes: int):
    """Pick (TB, TF, grid_b, grid_f) for the flattened (batch, feat_pad) slab.

    Guarantees: block bytes ~<= target_bytes (no whole-array fallback), TF is a
    multiple of 128, TB is sublane-aligned (dtype-aware) or the full batch dim,
    the feature tile never starves the batch tile, and there are enough grid
    steps for v7x's two TensorCores to both pipeline.
    """
    sublane = _SUBLANE_BY_ITEMSIZE.get(itemsize, 8)

    # Feature (lane) tile: full padded rows if one sublane group of them fits the
    # budget (fully contiguous DMA), else the largest 128-multiple that does.
    max_tf = max(_LANE, (target_bytes // (sublane * itemsize)) // _LANE * _LANE)
    tf = min(feat_pad, max_tf)

    # Batch (sublane) tile: as many rows as the remaining budget allows.
    rows = max(sublane, (target_bytes // (tf * itemsize)) // sublane * sublane)
    tb = batch if batch <= rows else rows      # full dim is always a legal block

    grid_b = pl.cdiv(batch, tb)
    grid_f = pl.cdiv(feat_pad, tf)

    # Ensure enough grid steps (v7x megacore sharding + DMA/compute overlap).
    # Split F first (keeps per-row runs >= 2 KiB), then B; both loops make strict
    # progress, so this terminates.
    while grid_b * grid_f < _MIN_GRID_STEPS:
        if tf > _MIN_TF:
            tf = max(_MIN_TF, _round_up(tf // 2, _LANE))
            grid_f = pl.cdiv(feat_pad, tf)
        elif tb > sublane:
            tb = max(sublane, _round_up(tb // 2, sublane))
            grid_b = pl.cdiv(batch, tb)
        else:
            break

    return tb, tf, grid_b, grid_f


def drop_path(x, drop_prob: float = 0.0, training: bool = False, *,
              key=None, donate_x: bool = False, use_kernel=None):
    """Pallas DropPath forward. `x` has shape (B, ...); mask broadcasts over non-batch dims."""
    if drop_prob == 0.0 or not training:
        return x  # identity fast path, matches reference
    if key is None:
        raise ValueError(
            "drop_path: a PRNG `key` is required when training with drop_prob > 0 "
            "(falling back to a fixed key would reuse the same drop mask every call).")

    keep_prob = 1.0 - drop_prob
    orig_shape = x.shape
    B = orig_shape[0]
    F = int(math.prod(orig_shape[1:])) if x.ndim > 1 else 1

    # Per-sample random keep mask, exactly mirroring floor(keep_prob + U[0,1)).
    # Scale stays in f32 so low-precision inputs multiply in f32 and only the
    # final result is cast (bit-close to an fp32 x/keep_prob reference).
    rand = jax.random.uniform(key, (B,), dtype=jnp.float32)
    mask = jnp.floor(keep_prob + rand)                       # 1.0 = keep, 0.0 = drop
    scale = (mask * (1.0 / keep_prob)).astype(jnp.float32).reshape(B, 1)

    itemsize = jnp.dtype(x.dtype).itemsize
    total_bytes = B * F * itemsize
    if use_kernel is False or (use_kernel is None and total_bytes < _BYPASS_BYTES):
        # Tiny / fusible case: a standalone pallas_call forces an extra full
        # read+write pass over the activation; let XLA fuse the multiply instead.
        bshape = (B,) + (1,) * (x.ndim - 1)
        return (x * scale.reshape(bshape)).astype(x.dtype)

    x2 = x.reshape(B, F)
    F_pad = _round_up(F, _LANE)
    if F_pad != F:
        # Pad the flattened feature dim to a multiple of 128 for lane-dense
        # (unmasked) stores; padding is sliced off after the kernel.
        x2 = jnp.pad(x2, ((0, 0), (0, F_pad - F)))

    TB, TF, grid_b, grid_f = _choose_tiles(B, F_pad, itemsize, _target_block_bytes())
    grid = (grid_b, grid_f)

    # 2x double-buffered input blocks + 2x output blocks (+ tiny scale blocks),
    # plus headroom; capped well under every generation's physical VMEM.
    block_bytes = TB * TF * itemsize
    vmem_limit = int(min(48 * 1024 * 1024,
                         max(16 * 1024 * 1024, 4 * block_bytes + (2 << 20))))

    grid_spec = pltpu.PrefetchScalarGridSpec(
        num_scalar_prefetch=0,
        grid=grid,
        in_specs=[
            # Per-sample scale tile.  (TB, 1) blocks are tiny DMAs, but grid_b is
            # small for realistic DropPath batches, so this is acceptable.
            pl.BlockSpec((TB, 1), lambda i, j: (i, 0)),
            pl.BlockSpec((TB, TF), lambda i, j: (i, j)),     # activation tile
        ],
        out_specs=pl.BlockSpec((TB, TF), lambda i, j: (i, j)),
    )

    out2 = pl.pallas_call(
        _drop_path_kernel,
        out_shape=jax.ShapeDtypeStruct((B, F_pad), x.dtype),
        grid_spec=grid_spec,
        compiler_params=pltpu.CompilerParams(
            dimension_semantics=("parallel", "parallel"),
            vmem_limit_bytes=vmem_limit,
        ),
        # Donation hazard: with donate_x=True the caller must not reuse x after
        # this call (the aliased buffer is overwritten).
        input_output_aliases=({1: 0} if donate_x else {}),
    )(scale, x2)

    if F_pad != F:
        out2 = out2[:, :F]
    return out2.reshape(orig_shape)


class DropPath:
    """Drop paths (Stochastic Depth) per sample — Pallas/JAX version."""

    def __init__(self, drop_prob=None):
        self.drop_prob = 0.0 if drop_prob is None else float(drop_prob)
        self.training = True

    def __call__(self, x, *, key=None, donate_x=False, use_kernel=None):
        return drop_path(x, self.drop_prob, self.training,
                         key=key, donate_x=donate_x, use_kernel=use_kernel)


if __name__ == "__main__":
    root = jax.random.PRNGKey(0)
    k_x, k_mask, k_x2 = jax.random.split(root, 3)
    drop_prob = 0.25
    keep_prob = 1.0 - drop_prob

    # Case 1: small transformer-style shape (batch, seq, hidden); F = 256 is a
    # multiple of 128 (lane-dense, no padding).  Force the Pallas kernel (the
    # auto path would bypass such a tiny tensor and let XLA fuse instead).
    B, L, D = 2, 8, 32
    x = jax.random.normal(k_x, (B, L, D), dtype=jnp.float32)
    module = DropPath(drop_prob=drop_prob)
    module.training = True
    out = jax.block_until_ready(module(x, key=k_mask, use_kernel=True))

    rand = jax.random.uniform(k_mask, (B,), dtype=jnp.float32)
    mask = jnp.floor(keep_prob + rand).reshape(B, 1, 1)
    ref = x / keep_prob * mask
    assert out.shape == x.shape and out.dtype == x.dtype
    assert jnp.allclose(out, ref, atol=1e-6, rtol=1e-5)

    # Case 2: F = 100 is NOT a multiple of 128 -> exercises the pad-to-128 path.
    B2, L2, D2 = 2, 5, 20
    x_np = jax.random.normal(k_x2, (B2, L2, D2), dtype=jnp.float32)
    out_np = jax.block_until_ready(
        drop_path(x_np, drop_prob, True, key=k_mask, use_kernel=True))
    rand2 = jax.random.uniform(k_mask, (B2,), dtype=jnp.float32)
    mask2 = jnp.floor(keep_prob + rand2).reshape(B2, 1, 1)
    ref2 = x_np / keep_prob * mask2
    assert out_np.shape == x_np.shape and out_np.dtype == x_np.dtype
    assert jnp.allclose(out_np, ref2, atol=1e-6, rtol=1e-5)

    # Case 3: auto bypass path (tiny tensor -> plain JAX multiply), same numerics.
    out_auto = jax.block_until_ready(module(x, key=k_mask))
    assert jnp.allclose(out_auto, ref, atol=1e-6, rtol=1e-5)

    # Case 4: eval / drop_prob == 0 paths are identity, no kernel launch.
    module.training = False
    out_eval = jax.block_until_ready(module(x))
    assert jnp.array_equal(out_eval, x)
    assert jnp.array_equal(
        jax.block_until_ready(drop_path(x, 0.0, True, key=k_mask)), x)

    print("KERNEL_OK")
</pallas_src>

<mosaic_0001>
module attributes {stable_mosaic.version = 11 : i64} {
  func.func @_drop_path_kernel(%arg0: i32, %arg1: i32, %arg2: memref<2x1xf32, #tpu.memory_space<vmem>>, %arg3: memref<2x256xf32, #tpu.memory_space<vmem>>, %arg4: memref<2x256xf32, #tpu.memory_space<vmem>>) attributes {dimension_semantics = [#tpu.dimension_semantics<parallel>, #tpu.dimension_semantics<parallel>], iteration_bounds = array<i64: 1, 1>, scalar_prefetch = 0 : i64, scratch_operands = 0 : i64, tpu.core_type = #tpu.core_type<tc>, window_params = [{transform_indices = @transform_0, window_bounds = array<i64: 2, 1>}, {transform_indices = @transform_1, window_bounds = array<i64: 2, 256>}, {transform_indices = @transform_2, window_bounds = array<i64: 2, 256>}]} {
    %c0 = arith.constant 0 : index
    %c0_0 = arith.constant 0 : index
    %0 = vector.load %arg3[%c0, %c0_0] : memref<2x256xf32, #tpu.memory_space<vmem>>, vector<2x256xf32>
    %c0_1 = arith.constant 0 : index
    %c0_2 = arith.constant 0 : index
    %1 = vector.load %arg2[%c0_1, %c0_2] : memref<2x1xf32, #tpu.memory_space<vmem>>, vector<2x1xf32>
    %2 = vector.broadcast %1 : vector<2x1xf32> to vector<2x256xf32>
    %3 = arith.mulf %0, %2 : vector<2x256xf32>
    %c0_3 = arith.constant 0 : index
    %c0_4 = arith.constant 0 : index
    %4 = vector.load %arg4[%c0_3, %c0_4] : memref<2x256xf32, #tpu.memory_space<vmem>>, vector<2x256xf32>
    tpu.vector_store %arg4[%c0_3, %c0_4], %3 {strides = array<i32>} : memref<2x256xf32, #tpu.memory_space<vmem>>, vector<2x256xf32>,
    return
  }
  func.func @transform_0(%arg0: i32, %arg1: i32) -> (i32, i32) {
    %c0_i32 = arith.constant 0 : i32
    %c0_i32_0 = arith.constant 0 : i32
    return %arg0, %c0_i32 : i32, i32
  }
  func.func @transform_1(%arg0: i32, %arg1: i32) -> (i32, i32) {
    %c0_i32 = arith.constant 0 : i32
    return %arg0, %arg1 : i32, i32
  }
  func.func @transform_2(%arg0: i32, %arg1: i32) -> (i32, i32) {
    %c0_i32 = arith.constant 0 : i32
    return %arg0, %arg1 : i32, i32
  }
}

</mosaic_0001>

<bundles_post_ra>
// kernel: tpu_custom_call.1
= control target key start
LH: loop header
LB: loop body
LE: loop exit
PB: predicated region body
PF: predicated region fallthrough
CT: control target
= control target key end

     0   :  { %v68_v1 = vmov 0   ;;  %s95_s0 = inlined_call_operand.vmem [shape: f32[2,1], index: 0, kind: input, shape index: {}]   ;;  %s96_s1 = inlined_call_operand.vmem [shape: f32[2,256], index: 1, kind: input, shape index: {}]   ;;  %s97_s2 = inlined_call_operand.hbm [shape: f32[2,256], index: 2, kind: output, shape index: {}]  }
   0x1   :  { %v13_v0 = vld [vmem:[%s95_s0] sm:$0x3]  ;;  %45 = vset.pattern.permute.xlu0 %v68_v1 }
   0x2   :  { %7 = vsyncpa [#allocation3], 0  ;;  %16 = vperm.xlu0 %45, %v13_v0   ;;  %v69_v2 = vmov 269488144   ;;  %v21_v4 = vlaneseq  ;;  %v12_v9 = vld [vmem:[%s96_s1] sm:$0xf] }
   0x3   :  { %v19_v3 = vunpack.c.l.s4 %v69_v2  ;;  %s70_s13 = smov [#allocation2]  }
   0x4   :  { %v22_v6 = vshrl.u32 %v21_v4, 7  ;;  %s34_s14 = sshll.u32 %s70_s13, 4  ;;  %s35_s14 = int_to_ptr.vmem [resolvable:$true] %s34_s14 }
   0x5   :  { %v20_v5 = vunpack.c.0.s8 %v19_v3  ;;  %s46_s0 = scalar_lea.vmem %s35_s14, 64  ;;  %p51_p1 = scmp.lt.s32.totalorder %s35_s14, %s35_s14 }
   0x6   :  { %p47_p0 = scmp.ne.s32.totalorder %s35_s14, %s46_s0  ;;  %p52_p2 = scmp.lt.s32.totalorder %s46_s0, %s46_s0 }
   0x7   :  { %v23_v7 = vsub.s32 %v20_v5, %v22_v6 }
   0x8   :  { %p53_p3 = por %p52_p2, %p51_p1 }
   0xa   :  { %p54_p4 = pnand %p53_p3, %p47_p0 }
  0x7d   :  { %v17_v8 = vpop.permute.xlu0 %16 }
  0x7e   :  { %v24_v10 = vrot.slane %v17_v8, %v23_v7 }
  0x80   :  { %v26_v11 = vmul.f32 %v24_v10, %v12_v9 }
  0x82   :  { %27 = vst [vmem:[#allocation2] sm:$0xf] %v26_v11 }
  0x83   :  { %57 = shalt.err (!%p54_p4)
}
  0x84   :  { %37 = dma.vmem_to_hbm [thread:$0]  %s35_s14, 64, %s97_s2, [#allocation3]  }
  0x85   :  { %66 = dma.done.wait [#allocation3], 64  }
  0x86   :  { %67 = vsyncadd [#allocation3], 4294967232 }
  0x87   :  { %41 = vsyncpa [#allocation3], 1 }

</bundles_post_ra>
